<compile_context>
chip_gen: v7x
topology: tpu7x:2x2x1
jax: 0.10.0
libtpu: 0.0.40
codegen_flags: <defaults>
</compile_context>

<pallas_src>
import jax
import jax.numpy as jnp
from jax import lax
from jax.experimental import pallas as pl
from jax.experimental.pallas import tpu as pltpu


_LANE = 128
_SUBLANE = 8


def _round_up(x, m):
    return ((x + m - 1) // m) * m


def temporal_attention_kernel(p_ref, h_ref, w_ref, b_ref, gamma_ref, beta_ref,
                              scores_ref, out_ref):
    """One batch tile.

    p_ref:      (TB, 2H)        present output (size-1 dim squeezed in wrapper)
    h_ref:      (TB, T-1, 2H)   history
    w_ref:      (4H, H)         fnn Linear weight, pre-transposed (y = x @ W^T)
    b/gamma/beta: (1, H)
    scores_ref: (TB, T-1)       attention scores (no softmax in the original)
    out_ref:    (TB, H)         LayerNorm(LeakyReLU(Linear(cat[p, attn])))
    """
    p = p_ref[...].astype(jnp.float32)                       # (TB, 2H)
    two_h = p.shape[-1]
    t_m1 = h_ref.shape[1]
    scale = 1.0 / jnp.sqrt(jnp.float32(two_h))

    # Fused scores/attn loop over the small, static time axis (unrolled).
    # Keeps the live set to (TB, 2H) slabs -- no (TB, T-1, 2H) f32 temporaries.
    attn = jnp.zeros_like(p)                                  # (TB, 2H) f32
    s_cols = []
    for t in range(t_m1):                                     # static unroll
        h_t = h_ref[:, t, :].astype(jnp.float32)              # (TB, 2H)
        s_t = jnp.sum(p * h_t, axis=-1, keepdims=True) * scale  # (TB, 1)
        s_cols.append(s_t)
        attn = attn + s_t * h_t

    # Single store for the scores block.
    scores_ref[...] = jnp.concatenate(s_cols, axis=-1).astype(scores_ref.dtype)

    # Concat-free FFN: cat([p, attn], -1) @ W == p @ W[:2H] + attn @ W[2H:].
    wp = w_ref[:two_h, :].astype(jnp.float32)                 # (2H, H)
    wa = w_ref[two_h:, :].astype(jnp.float32)                 # (2H, H)
    y = jnp.dot(p, wp, preferred_element_type=jnp.float32)
    y = y + jnp.dot(attn, wa, preferred_element_type=jnp.float32)
    y = y + b_ref[...].astype(jnp.float32)                    # (TB, H)

    # LeakyReLU (negative_slope=0.01)
    y = jnp.where(y > 0, y, 0.01 * y)

    # LayerNorm(H, eps=1e-5)
    mean = jnp.mean(y, axis=-1, keepdims=True)
    var = jnp.mean((y - mean) ** 2, axis=-1, keepdims=True)
    y = (y - mean) * lax.rsqrt(var + 1e-5)
    y = y * gamma_ref[...].astype(jnp.float32) + beta_ref[...].astype(jnp.float32)

    out_ref[...] = y.astype(out_ref.dtype)


def _vmem_bytes_estimate(tb, t_m1, two_h, hid, in_itemsize):
    """Rough double-buffered VMEM footprint (last-two-dims tile padding)."""
    hist = tb * _round_up(t_m1, _SUBLANE) * _round_up(two_h, _LANE) * in_itemsize
    pres = tb * _round_up(two_h, _LANE) * in_itemsize
    scrs = tb * _round_up(t_m1, _LANE) * 4
    outb = tb * _round_up(hid, _LANE) * 4
    per_step = hist + pres + scrs + outb
    # x2 for pipeline double-buffering + slack for (TB, 2H) f32 intermediates.
    return 2 * per_step + 4 * tb * _round_up(two_h, _LANE) * 4


def temporal_attention(present, history, w_t, b, gamma, beta,
                       batch_size, asset_num, hidden_dim, tile_b=2048):
    """present: (B*N, 1, 2H), history: (B*N, T-1, 2H), w_t: (4H, H).

    Returns (attention_output (B, N, H), attention_scores (B*N, 1, T-1)).
    """
    BN, one, two_h = present.shape
    t_m1 = history.shape[1]
    assert one == 1
    assert BN == batch_size * asset_num
    assert two_h == 2 * hidden_dim
    assert history.shape == (BN, t_m1, two_h)
    assert w_t.shape == (4 * hidden_dim, hidden_dim)

    # Only wrapper-side data movement: squeeze present's size-1 dim (tiny).
    # history goes to the kernel untouched (no pad / cast / transpose pass).
    p2 = present.reshape(BN, two_h)

    # Batch tile: as large as the VMEM budget allows (amortizes the ~0.35us
    # per-grid-step overhead).  BN need not be a multiple of tb: the grid uses
    # cdiv and the ragged last block is handled by the pipeline.
    in_itemsize = jnp.dtype(history.dtype).itemsize
    tb = _round_up(max(int(min(int(tile_b), BN)), _SUBLANE), _SUBLANE)
    vmem_budget = 36 * 1024 * 1024
    while tb > 256 and _vmem_bytes_estimate(tb, t_m1, two_h, hidden_dim,
                                            in_itemsize) > vmem_budget:
        tb = _round_up(max(tb // 2, 256), _SUBLANE)
    # v7x megacore: if a large problem would fit in a single block, split it
    # in two so the "parallel" grid axis can shard across the 2 TensorCores.
    if BN >= 2048 and pl.cdiv(BN, tb) < 2:
        tb = _round_up(pl.cdiv(BN, 2), _SUBLANE)
    grid = (pl.cdiv(BN, tb),)

    grid_spec = pltpu.PrefetchScalarGridSpec(
        num_scalar_prefetch=0,
        grid=grid,
        in_specs=[
            pl.BlockSpec((tb, two_h), lambda i: (i, 0)),                 # present
            pl.BlockSpec((tb, t_m1, two_h), lambda i: (i, 0, 0)),        # history
            pl.BlockSpec((4 * hidden_dim, hidden_dim), lambda i: (0, 0)),  # W^T
            pl.BlockSpec((1, hidden_dim), lambda i: (0, 0)),             # bias
            pl.BlockSpec((1, hidden_dim), lambda i: (0, 0)),             # gamma
            pl.BlockSpec((1, hidden_dim), lambda i: (0, 0)),             # beta
        ],
        out_specs=[
            pl.BlockSpec((tb, t_m1), lambda i: (i, 0)),                  # scores
            pl.BlockSpec((tb, hidden_dim), lambda i: (i, 0)),            # fnn out
        ],
    )

    flops = int(BN * (4 * t_m1 * two_h            # fused scores + attn
                      + 2 * (2 * two_h) * hidden_dim  # FFN matmul
                      + 10 * hidden_dim))             # leaky relu + layernorm
    bytes_accessed = int(
        in_itemsize * (BN * t_m1 * two_h + BN * two_h)
        + 4 * (BN * t_m1 + BN * hidden_dim
               + 4 * hidden_dim * hidden_dim + 3 * hidden_dim))
    cost = pl.CostEstimate(flops=flops, transcendentals=int(BN),
                           bytes_accessed=bytes_accessed)

    scores, out = pl.pallas_call(
        temporal_attention_kernel,
        out_shape=(
            jax.ShapeDtypeStruct((BN, t_m1), jnp.float32),
            jax.ShapeDtypeStruct((BN, hidden_dim), jnp.float32),
        ),
        grid_spec=grid_spec,
        compiler_params=pltpu.CompilerParams(
            dimension_semantics=("parallel",),
            vmem_limit_bytes=48 * 1024 * 1024,
        ),
        cost_estimate=cost,
    )(p2, history, w_t, b, gamma, beta)

    attention_output = out.reshape(batch_size, asset_num, hidden_dim)
    attention_scores = scores.reshape(BN, 1, t_m1)
    return attention_output, attention_scores


def reference_forward(present, history, w_t, b, gamma, beta,
                      batch_size, asset_num, hidden_dim):
    """Plain-JAX reference mirroring the PyTorch module (f32 math)."""
    p = present.astype(jnp.float32)
    h = history.astype(jnp.float32)
    scale = 1.0 / jnp.sqrt(jnp.float32(p.shape[-1]))
    scores = jnp.einsum('bik,bjk->bij', p, h) * scale
    attn = jnp.einsum('bij,bjk->bik', scores, h)
    x = jnp.concatenate([p, attn], -1).reshape(
        batch_size, asset_num, 4 * hidden_dim)
    y = x @ w_t + b[0]
    y = jnp.where(y > 0, y, 0.01 * y)
    mean = jnp.mean(y, -1, keepdims=True)
    var = jnp.mean((y - mean) ** 2, -1, keepdims=True)
    y = (y - mean) / jnp.sqrt(var + 1e-5)
    y = y * gamma[0] + beta[0]
    return y, scores


if __name__ == "__main__":
    # Small shapes consistent with the module:
    #   batch=2, assets=4, hidden_dim=16 (so 2H=32, 4H=64), T-1=8
    B, N, H = 2, 4, 16
    Tm1 = 8
    two_h, four_h = 2 * H, 4 * H

    key = jax.random.PRNGKey(0)
    k1, k2, k3, k4 = jax.random.split(key, 4)

    present = jax.random.normal(k1, (B * N, 1, two_h), jnp.float32)
    history = jax.random.normal(k2, (B * N, Tm1, two_h), jnp.float32)

    # nn.Linear(4H, H): weight (H, 4H), bias (H,) — deterministic uniform init.
    bound = 1.0 / (four_h ** 0.5)
    w = jax.random.uniform(k3, (H, four_h), jnp.float32, -bound, bound)
    w_t = jnp.asarray(w.T)                                   # (4H, H)
    b = jax.random.uniform(k4, (1, H), jnp.float32, -bound, bound)
    # nn.LayerNorm(H) default init: gamma=1, beta=0.
    gamma = jnp.ones((1, H), jnp.float32)
    beta = jnp.zeros((1, H), jnp.float32)

    out, scores = temporal_attention(present, history, w_t, b, gamma, beta,
                                     batch_size=B, asset_num=N, hidden_dim=H)
    jax.block_until_ready((out, scores))

    ref_out, ref_scores = reference_forward(present, history, w_t, b,
                                            gamma, beta, B, N, H)
    assert out.shape == (B, N, H) and scores.shape == (B * N, 1, Tm1)
    assert jnp.allclose(out, ref_out, atol=1e-4, rtol=1e-4)
    assert jnp.allclose(scores, ref_scores, atol=1e-4, rtol=1e-4)

    print("KERNEL_OK")
</pallas_src>

<mosaic_0001>
module attributes {stable_mosaic.version = 11 : i64} {
  func.func @temporal_attention_kernel(%arg0: i32, %arg1: memref<8x32xf32, #tpu.memory_space<vmem>>, %arg2: memref<8x8x32xf32, #tpu.memory_space<vmem>>, %arg3: memref<64x16xf32, #tpu.memory_space<vmem>>, %arg4: memref<1x16xf32, #tpu.memory_space<vmem>>, %arg5: memref<1x16xf32, #tpu.memory_space<vmem>>, %arg6: memref<1x16xf32, #tpu.memory_space<vmem>>, %arg7: memref<8x8xf32, #tpu.memory_space<vmem>>, %arg8: memref<8x16xf32, #tpu.memory_space<vmem>>) attributes {dimension_semantics = [#tpu.dimension_semantics<parallel>], iteration_bounds = array<i64: 1>, scalar_prefetch = 0 : i64, scratch_operands = 0 : i64, tpu.core_type = #tpu.core_type<tc>, window_params = [{transform_indices = @transform_0, window_bounds = array<i64: 8, 32>}, {transform_indices = @transform_1, window_bounds = array<i64: 8, 8, 32>}, {pipeline_mode = #tpu.pipeline_mode<synchronous>, transform_indices = @transform_2, window_bounds = array<i64: 64, 16>}, {pipeline_mode = #tpu.pipeline_mode<synchronous>, transform_indices = @transform_3, window_bounds = array<i64: 1, 16>}, {pipeline_mode = #tpu.pipeline_mode<synchronous>, transform_indices = @transform_4, window_bounds = array<i64: 1, 16>}, {pipeline_mode = #tpu.pipeline_mode<synchronous>, transform_indices = @transform_5, window_bounds = array<i64: 1, 16>}, {transform_indices = @transform_6, window_bounds = array<i64: 8, 8>}, {transform_indices = @transform_7, window_bounds = array<i64: 8, 16>}]} {
    %c0 = arith.constant 0 : index
    %c0_0 = arith.constant 0 : index
    %0 = vector.load %arg1[%c0, %c0_0] : memref<8x32xf32, #tpu.memory_space<vmem>>, vector<8x32xf32>
    %cst = arith.constant 3.200000e+01 : f32
    %1 = math.sqrt %cst : f32
    %cst_1 = arith.constant 1.000000e+00 : f32
    %2 = arith.divf %cst_1, %1 : f32
    %cst_2 = arith.constant 0.000000e+00 : f32
    %3 = vector.broadcast %cst_2 : f32 to vector<8x32xf32>
    %c0_3 = arith.constant 0 : index
    %c0_4 = arith.constant 0 : index
    %c0_5 = arith.constant 0 : index
    %4 = vector.load %arg2[%c0_3, %c0_4, %c0_5] : memref<8x8x32xf32, #tpu.memory_space<vmem>>, vector<8x1x32xf32>
    %5 = vector.shape_cast %4 : vector<8x1x32xf32> to vector<8x32xf32>
    %6 = arith.mulf %0, %5 : vector<8x32xf32>
    %cst_6 = arith.constant dense<0.000000e+00> : vector<8xf32>
    %7 = vector.multi_reduction <add>, %6, %cst_6 [1] : vector<8x32xf32> to vector<8xf32>
    %8 = vector.shape_cast %7 : vector<8xf32> to vector<8x1xf32>
    %9 = vector.broadcast %2 : f32 to vector<8x1xf32>
    %10 = arith.mulf %8, %9 : vector<8x1xf32>
    %11 = vector.broadcast %10 : vector<8x1xf32> to vector<8x32xf32>
    %12 = arith.mulf %11, %5 : vector<8x32xf32>
    %13 = arith.addf %3, %12 : vector<8x32xf32>
    %c0_7 = arith.constant 0 : index
    %c1 = arith.constant 1 : index
    %c0_8 = arith.constant 0 : index
    %14 = vector.load %arg2[%c0_7, %c1, %c0_8] : memref<8x8x32xf32, #tpu.memory_space<vmem>>, vector<8x1x32xf32>
    %15 = vector.shape_cast %14 : vector<8x1x32xf32> to vector<8x32xf32>
    %16 = arith.mulf %0, %15 : vector<8x32xf32>
    %cst_9 = arith.constant dense<0.000000e+00> : vector<8xf32>
    %17 = vector.multi_reduction <add>, %16, %cst_9 [1] : vector<8x32xf32> to vector<8xf32>
    %18 = vector.shape_cast %17 : vector<8xf32> to vector<8x1xf32>
    %19 = vector.broadcast %2 : f32 to vector<8x1xf32>
    %20 = arith.mulf %18, %19 : vector<8x1xf32>
    %21 = vector.broadcast %20 : vector<8x1xf32> to vector<8x32xf32>
    %22 = arith.mulf %21, %15 : vector<8x32xf32>
    %23 = arith.addf %13, %22 : vector<8x32xf32>
    %c0_10 = arith.constant 0 : index
    %c2 = arith.constant 2 : index
    %c0_11 = arith.constant 0 : index
    %24 = vector.load %arg2[%c0_10, %c2, %c0_11] : memref<8x8x32xf32, #tpu.memory_space<vmem>>, vector<8x1x32xf32>
    %25 = vector.shape_cast %24 : vector<8x1x32xf32> to vector<8x32xf32>
    %26 = arith.mulf %0, %25 : vector<8x32xf32>
    %cst_12 = arith.constant dense<0.000000e+00> : vector<8xf32>
    %27 = vector.multi_reduction <add>, %26, %cst_12 [1] : vector<8x32xf32> to vector<8xf32>
    %28 = vector.shape_cast %27 : vector<8xf32> to vector<8x1xf32>
    %29 = vector.broadcast %2 : f32 to vector<8x1xf32>
    %30 = arith.mulf %28, %29 : vector<8x1xf32>
    %31 = vector.broadcast %30 : vector<8x1xf32> to vector<8x32xf32>
    %32 = arith.mulf %31, %25 : vector<8x32xf32>
    %33 = arith.addf %23, %32 : vector<8x32xf32>
    %c0_13 = arith.constant 0 : index
    %c3 = arith.constant 3 : index
    %c0_14 = arith.constant 0 : index
    %34 = vector.load %arg2[%c0_13, %c3, %c0_14] : memref<8x8x32xf32, #tpu.memory_space<vmem>>, vector<8x1x32xf32>
    %35 = vector.shape_cast %34 : vector<8x1x32xf32> to vector<8x32xf32>
    %36 = arith.mulf %0, %35 : vector<8x32xf32>
    %cst_15 = arith.constant dense<0.000000e+00> : vector<8xf32>
    %37 = vector.multi_reduction <add>, %36, %cst_15 [1] : vector<8x32xf32> to vector<8xf32>
    %38 = vector.shape_cast %37 : vector<8xf32> to vector<8x1xf32>
    %39 = vector.broadcast %2 : f32 to vector<8x1xf32>
    %40 = arith.mulf %38, %39 : vector<8x1xf32>
    %41 = vector.broadcast %40 : vector<8x1xf32> to vector<8x32xf32>
    %42 = arith.mulf %41, %35 : vector<8x32xf32>
    %43 = arith.addf %33, %42 : vector<8x32xf32>
    %c0_16 = arith.constant 0 : index
    %c4 = arith.constant 4 : index
    %c0_17 = arith.constant 0 : index
    %44 = vector.load %arg2[%c0_16, %c4, %c0_17] : memref<8x8x32xf32, #tpu.memory_space<vmem>>, vector<8x1x32xf32>
    %45 = vector.shape_cast %44 : vector<8x1x32xf32> to vector<8x32xf32>
    %46 = arith.mulf %0, %45 : vector<8x32xf32>
    %cst_18 = arith.constant dense<0.000000e+00> : vector<8xf32>
    %47 = vector.multi_reduction <add>, %46, %cst_18 [1] : vector<8x32xf32> to vector<8xf32>
    %48 = vector.shape_cast %47 : vector<8xf32> to vector<8x1xf32>
    %49 = vector.broadcast %2 : f32 to vector<8x1xf32>
    %50 = arith.mulf %48, %49 : vector<8x1xf32>
    %51 = vector.broadcast %50 : vector<8x1xf32> to vector<8x32xf32>
    %52 = arith.mulf %51, %45 : vector<8x32xf32>
    %53 = arith.addf %43, %52 : vector<8x32xf32>
    %c0_19 = arith.constant 0 : index
    %c5 = arith.constant 5 : index
    %c0_20 = arith.constant 0 : index
    %54 = vector.load %arg2[%c0_19, %c5, %c0_20] : memref<8x8x32xf32, #tpu.memory_space<vmem>>, vector<8x1x32xf32>
    %55 = vector.shape_cast %54 : vector<8x1x32xf32> to vector<8x32xf32>
    %56 = arith.mulf %0, %55 : vector<8x32xf32>
    %cst_21 = arith.constant dense<0.000000e+00> : vector<8xf32>
    %57 = vector.multi_reduction <add>, %56, %cst_21 [1] : vector<8x32xf32> to vector<8xf32>
    %58 = vector.shape_cast %57 : vector<8xf32> to vector<8x1xf32>
    %59 = vector.broadcast %2 : f32 to vector<8x1xf32>
    %60 = arith.mulf %58, %59 : vector<8x1xf32>
    %61 = vector.broadcast %60 : vector<8x1xf32> to vector<8x32xf32>
    %62 = arith.mulf %61, %55 : vector<8x32xf32>
    %63 = arith.addf %53, %62 : vector<8x32xf32>
    %c0_22 = arith.constant 0 : index
    %c6 = arith.constant 6 : index
    %c0_23 = arith.constant 0 : index
    %64 = vector.load %arg2[%c0_22, %c6, %c0_23] : memref<8x8x32xf32, #tpu.memory_space<vmem>>, vector<8x1x32xf32>
    %65 = vector.shape_cast %64 : vector<8x1x32xf32> to vector<8x32xf32>
    %66 = arith.mulf %0, %65 : vector<8x32xf32>
    %cst_24 = arith.constant dense<0.000000e+00> : vector<8xf32>
    %67 = vector.multi_reduction <add>, %66, %cst_24 [1] : vector<8x32xf32> to vector<8xf32>
    %68 = vector.shape_cast %67 : vector<8xf32> to vector<8x1xf32>
    %69 = vector.broadcast %2 : f32 to vector<8x1xf32>
    %70 = arith.mulf %68, %69 : vector<8x1xf32>
    %71 = vector.broadcast %70 : vector<8x1xf32> to vector<8x32xf32>
    %72 = arith.mulf %71, %65 : vector<8x32xf32>
    %73 = arith.addf %63, %72 : vector<8x32xf32>
    %c0_25 = arith.constant 0 : index
    %c7 = arith.constant 7 : index
    %c0_26 = arith.constant 0 : index
    %74 = vector.load %arg2[%c0_25, %c7, %c0_26] : memref<8x8x32xf32, #tpu.memory_space<vmem>>, vector<8x1x32xf32>
    %75 = vector.shape_cast %74 : vector<8x1x32xf32> to vector<8x32xf32>
    %76 = arith.mulf %0, %75 : vector<8x32xf32>
    %cst_27 = arith.constant dense<0.000000e+00> : vector<8xf32>
    %77 = vector.multi_reduction <add>, %76, %cst_27 [1] : vector<8x32xf32> to vector<8xf32>
    %78 = vector.shape_cast %77 : vector<8xf32> to vector<8x1xf32>
    %79 = vector.broadcast %2 : f32 to vector<8x1xf32>
    %80 = arith.mulf %78, %79 : vector<8x1xf32>
    %81 = vector.broadcast %80 : vector<8x1xf32> to vector<8x32xf32>
    %82 = arith.mulf %81, %75 : vector<8x32xf32>
    %83 = arith.addf %73, %82 : vector<8x32xf32>
    %84 = tpu.concatenate %10, %20, %30, %40, %50, %60, %70, %80 in 1 : vector<8x1xf32>, vector<8x1xf32>, vector<8x1xf32>, vector<8x1xf32>, vector<8x1xf32>, vector<8x1xf32>, vector<8x1xf32>, vector<8x1xf32> -> vector<8x8xf32>
    %c0_28 = arith.constant 0 : index
    %c0_29 = arith.constant 0 : index
    %85 = vector.load %arg7[%c0_28, %c0_29] : memref<8x8xf32, #tpu.memory_space<vmem>>, vector<8x8xf32>
    tpu.vector_store %arg7[%c0_28, %c0_29], %84 {strides = array<i32>} : memref<8x8xf32, #tpu.memory_space<vmem>>, vector<8x8xf32>,
    %c0_30 = arith.constant 0 : index
    %c0_31 = arith.constant 0 : index
    %86 = vector.load %arg3[%c0_30, %c0_31] : memref<64x16xf32, #tpu.memory_space<vmem>>, vector<32x16xf32>
    %c32 = arith.constant 32 : index
    %c0_32 = arith.constant 0 : index
    %87 = vector.load %arg3[%c32, %c0_32] : memref<64x16xf32, #tpu.memory_space<vmem>>, vector<32x16xf32>
    %cst_33 = arith.constant dense<0.000000e+00> : vector<8x16xf32>
    %88 = tpu.matmul %0, %86, %cst_33 {dimension_numbers = #tpu.dot_dimension_numbers<[1], [0], [0], [1], [0, 0, 1, 1], [], []>} : vector<8x32xf32>, vector<32x16xf32>, vector<8x16xf32> -> vector<8x16xf32>
    %cst_34 = arith.constant dense<0.000000e+00> : vector<8x16xf32>
    %89 = tpu.matmul %83, %87, %cst_34 {dimension_numbers = #tpu.dot_dimension_numbers<[1], [0], [0], [1], [0, 0, 1, 1], [], []>} : vector<8x32xf32>, vector<32x16xf32>, vector<8x16xf32> -> vector<8x16xf32>
    %90 = arith.addf %88, %89 : vector<8x16xf32>
    %c0_35 = arith.constant 0 : index
    %c0_36 = arith.constant 0 : index
    %91 = vector.load %arg4[%c0_35, %c0_36] : memref<1x16xf32, #tpu.memory_space<vmem>>, vector<1x16xf32>
    %92 = vector.broadcast %91 : vector<1x16xf32> to vector<8x16xf32>
    %93 = arith.addf %90, %92 : vector<8x16xf32>
    %cst_37 = arith.constant 0.000000e+00 : f32
    %94 = vector.broadcast %cst_37 : f32 to vector<8x16xf32>
    %95 = arith.cmpf ogt, %93, %94 : vector<8x16xf32>
    %cst_38 = arith.constant 0.00999999977 : f32
    %96 = vector.broadcast %cst_38 : f32 to vector<8x16xf32>
    %97 = arith.mulf %96, %93 : vector<8x16xf32>
    %98 = arith.select %95, %93, %97 : vector<8x16xi1>, vector<8x16xf32>
    %cst_39 = arith.constant dense<0.000000e+00> : vector<8xf32>
    %99 = vector.multi_reduction <add>, %98, %cst_39 [1] : vector<8x16xf32> to vector<8xf32>
    %100 = vector.shape_cast %99 : vector<8xf32> to vector<8x1xf32>
    %cst_40 = arith.constant 1.600000e+01 : f32
    %101 = vector.broadcast %cst_40 : f32 to vector<8x1xf32>
    %102 = arith.divf %100, %101 : vector<8x1xf32>
    %103 = vector.broadcast %102 : vector<8x1xf32> to vector<8x16xf32>
    %104 = arith.subf %98, %103 : vector<8x16xf32>
    %105 = arith.mulf %104, %104 : vector<8x16xf32>
    %cst_41 = arith.constant dense<0.000000e+00> : vector<8xf32>
    %106 = vector.multi_reduction <add>, %105, %cst_41 [1] : vector<8x16xf32> to vector<8xf32>
    %107 = vector.shape_cast %106 : vector<8xf32> to vector<8x1xf32>
    %cst_42 = arith.constant 1.600000e+01 : f32
    %108 = vector.broadcast %cst_42 : f32 to vector<8x1xf32>
    %109 = arith.divf %107, %108 : vector<8x1xf32>
    %110 = vector.broadcast %102 : vector<8x1xf32> to vector<8x16xf32>
    %111 = arith.subf %98, %110 : vector<8x16xf32>
    %cst_43 = arith.constant 9.99999974E-6 : f32
    %112 = vector.broadcast %cst_43 : f32 to vector<8x1xf32>
    %113 = arith.addf %109, %112 : vector<8x1xf32>
    %114 = math.rsqrt %113 : vector<8x1xf32>
    %115 = vector.broadcast %114 : vector<8x1xf32> to vector<8x16xf32>
    %116 = arith.mulf %111, %115 : vector<8x16xf32>
    %c0_44 = arith.constant 0 : index
    %c0_45 = arith.constant 0 : index
    %117 = vector.load %arg5[%c0_44, %c0_45] : memref<1x16xf32, #tpu.memory_space<vmem>>, vector<1x16xf32>
    %118 = vector.broadcast %117 : vector<1x16xf32> to vector<8x16xf32>
    %119 = arith.mulf %116, %118 : vector<8x16xf32>
    %c0_46 = arith.constant 0 : index
    %c0_47 = arith.constant 0 : index
    %120 = vector.load %arg6[%c0_46, %c0_47] : memref<1x16xf32, #tpu.memory_space<vmem>>, vector<1x16xf32>
    %121 = vector.broadcast %120 : vector<1x16xf32> to vector<8x16xf32>
    %122 = arith.addf %119, %121 : vector<8x16xf32>
    %c0_48 = arith.constant 0 : index
    %c0_49 = arith.constant 0 : index
    %123 = vector.load %arg8[%c0_48, %c0_49] : memref<8x16xf32, #tpu.memory_space<vmem>>, vector<8x16xf32>
    tpu.vector_store %arg8[%c0_48, %c0_49], %122 {strides = array<i32>} : memref<8x16xf32, #tpu.memory_space<vmem>>, vector<8x16xf32>,
    return
  }
  func.func @transform_0(%arg0: i32) -> (i32, i32) {
    %c0_i32 = arith.constant 0 : i32
    %c0_i32_0 = arith.constant 0 : i32
    return %arg0, %c0_i32 : i32, i32
  }
  func.func @transform_1(%arg0: i32) -> (i32, i32, i32) {
    %c0_i32 = arith.constant 0 : i32
    %c0_i32_0 = arith.constant 0 : i32
    %c0_i32_1 = arith.constant 0 : i32
    return %arg0, %c0_i32, %c0_i32_0 : i32, i32, i32
  }
  func.func @transform_2(%arg0: i32) -> (i32, i32) {
    %c0_i32 = arith.constant 0 : i32
    %c0_i32_0 = arith.constant 0 : i32
    %c0_i32_1 = arith.constant 0 : i32
    return %c0_i32, %c0_i32_0 : i32, i32
  }
  func.func @transform_3(%arg0: i32) -> (i32, i32) {
    %c0_i32 = arith.constant 0 : i32
    %c0_i32_0 = arith.constant 0 : i32
    %c0_i32_1 = arith.constant 0 : i32
    return %c0_i32, %c0_i32_0 : i32, i32
  }
  func.func @transform_4(%arg0: i32) -> (i32, i32) {
    %c0_i32 = arith.constant 0 : i32
    %c0_i32_0 = arith.constant 0 : i32
    %c0_i32_1 = arith.constant 0 : i32
    return %c0_i32, %c0_i32_0 : i32, i32
  }
  func.func @transform_5(%arg0: i32) -> (i32, i32) {
    %c0_i32 = arith.constant 0 : i32
    %c0_i32_0 = arith.constant 0 : i32
    %c0_i32_1 = arith.constant 0 : i32
    return %c0_i32, %c0_i32_0 : i32, i32
  }
  func.func @transform_6(%arg0: i32) -> (i32, i32) {
    %c0_i32 = arith.constant 0 : i32
    %c0_i32_0 = arith.constant 0 : i32
    return %arg0, %c0_i32 : i32, i32
  }
  func.func @transform_7(%arg0: i32) -> (i32, i32) {
    %c0_i32 = arith.constant 0 : i32
    %c0_i32_0 = arith.constant 0 : i32
    return %arg0, %c0_i32 : i32, i32
  }
}

</mosaic_0001>

<bundles_post_ra>
// kernel: tpu_custom_call.1
= control target key start
LH: loop header
LB: loop body
LE: loop exit
PB: predicated region body
PF: predicated region fallthrough
CT: control target
= control target key end

     0   :  { %13 = vsyncpa [#allocation3], 0  ;;  %vm45_vm0 = vcmask 1041409   ;;  %vm48_vm1 = vcmask 1042434   ;;  %vm51_vm2 = vcmask 1043459   ;;  %vm54_vm3 = vcmask 1044484   ;;  %s1094_s0 = inlined_call_operand.vmem [shape: f32[8,32], index: 0, kind: input, shape index: {}]   ;;  %s1095_s1 = inlined_call_operand.vmem [shape: f32[8,8,32], index: 1, kind: input, shape index: {}]   ;;  %s1096_s2 = inlined_call_operand.vmem [shape: f32[64,16], index: 2, kind: input, shape index: {}]   ;;  %s1097_s3 = inlined_call_operand.vmem [shape: f32[1,16], index: 3, kind: input, shape index: {}]   ;;  %s1098_s4 = inlined_call_operand.vmem [shape: f32[1,16], index: 4, kind: input, shape index: {}]   ;;  %s1099_s5 = inlined_call_operand.vmem [shape: f32[1,16], index: 5, kind: input, shape index: {}]   ;;  %s1100_s6 = inlined_call_operand.hbm [shape: f32[8,8], index: 6, kind: output, shape index: {0}]   ;;  %s1101_s7 = inlined_call_operand.hbm [shape: f32[8,16], index: 7, kind: output, shape index: {1}]  }
   0x1   :  { %v28_v0 = vld [vmem:[%s1095_s1] sm:$0x1]  ;;  %v29_v1 = vld [vmem:[%s1095_s1 + $0x8] sm:$0x1]  ;;  %v30_v2 = vld [vmem:[%s1095_s1 + $0x10] sm:$0x1] }
   0x2   :  { %v31_v3 = vld [vmem:[%s1095_s1 + $0x18] sm:$0x1]  ;;  %v32_v4 = vld [vmem:[%s1095_s1 + $0x20] sm:$0x1]  ;;  %v33_v5 = vld [vmem:[%s1095_s1 + $0x28] sm:$0x1] }
   0x3   :  { %v34_v6 = vld [vmem:[%s1095_s1 + $0x30] sm:$0x1]  ;;  %v35_v7 = vld [vmem:[%s1095_s1 + $0x38] sm:$0x1]  ;;  %v44_v8 = vrot.slane %v29_v1, 7  ;;  %v47_v9 = vrot.slane %v30_v2, 6 }
   0x4   :  { %v50_v10 = vrot.slane %v31_v3, 5  ;;  %v53_v11 = vrot.slane %v32_v4, 4  ;;  %v56_v12 = vrot.slane %v33_v5, 3  ;;  %vm57_vm4 = vcmask 1045509   ;;  %v112_v15 = vld [vmem:[%s1095_s1 + $0x2] sm:$0x1] }
   0x5   :  { %v46_v13 = vsel %vm45_vm0, %v44_v8, %v28_v0  ;;  %v59_v14 = vrot.slane %v34_v6, 2  ;;  %v113_v16 = vld [vmem:[%s1095_s1 + $0xa] sm:$0x1]  ;;  %v114_v17 = vld [vmem:[%s1095_s1 + $0x12] sm:$0x1]  ;;  %vm60_vm5 = vcmask 1046534  }
   0x6   :  { %v49_v18 = vsel %vm48_vm1, %v47_v9, %v46_v13  ;;  %v62_v19 = vrot.slane %v35_v7, 1  ;;  %vm63_vm6 = vcmask 1047559   ;;  %v115_v20 = vld [vmem:[%s1095_s1 + $0x1a] sm:$0x1]  ;;  %v116_v22 = vld [vmem:[%s1095_s1 + $0x22] sm:$0x1] }
   0x7   :  { %v52_v21 = vsel %vm51_vm2, %v50_v10, %v49_v18  ;;  %v117_v23 = vld [vmem:[%s1095_s1 + $0x2a] sm:$0x1]  ;;  %v118_v24 = vld [vmem:[%s1095_s1 + $0x32] sm:$0x1]  ;;  %v119_v26 = vld [vmem:[%s1095_s1 + $0x3a] sm:$0x1] }
   0x8   :  { %v55_v25 = vsel %vm54_vm3, %v53_v11, %v52_v21  ;;  %v128_v27 = vrot.slane %v113_v16, 7  ;;  %v130_v28 = vrot.slane %v114_v17, 6  ;;  %v132_v29 = vrot.slane %v115_v20, 5  ;;  %v785_v30 = vld [vmem:[%s1094_s0] sm:$0xff]  ;;  %v75_v39 = vld [vmem:[%s1095_s1 + $0x9] sm:$0x1] }
   0x9   :  { %v58_v31 = vsel %vm57_vm4, %v56_v12, %v55_v25  ;;  %vm67_vm7 = vcmask 261120   ;;  %v134_v32 = vrot.slane %v116_v22, 4  ;;  %v136_v33 = vrot.slane %v117_v23, 3  ;;  %v74_v34 = vld [vmem:[%s1095_s1 + $0x1] sm:$0x1] }
   0xa   :  { %v61_v35 = vsel %vm60_vm5, %v59_v14, %v58_v31  ;;  %v129_v36 = vsel %vm45_vm0, %v128_v27, %v112_v15  ;;  %v138_v37 = vrot.slane %v118_v24, 2  ;;  %v140_v38 = vrot.slane %v119_v26, 1  ;;  %v76_v40 = vld [vmem:[%s1095_s1 + $0x11] sm:$0x1]  ;;  %v77_v43 = vld [vmem:[%s1095_s1 + $0x19] sm:$0x1] }
   0xb   :  { %v800_v41 = vsel %vm63_vm6, %v62_v19, %v61_v35  ;;  %v131_v42 = vsel %vm48_vm1, %v130_v28, %v129_v36  ;;  %v78_v44 = vld [vmem:[%s1095_s1 + $0x21] sm:$0x1]  ;;  %v79_v45 = vld [vmem:[%s1095_s1 + $0x29] sm:$0x1]  ;;  %v80_v48 = vld [vmem:[%s1095_s1 + $0x31] sm:$0x1] }
   0xc   :  { %v66_v46 = vmul.f32 %v800_v41, %v785_v30  ;;  %v133_v47 = vsel %vm51_vm2, %v132_v29, %v131_v42  ;;  %v81_v49 = vld [vmem:[%s1095_s1 + $0x39] sm:$0x1]  ;;  %v90_v50 = vrot.slane %v75_v39, 7  ;;  %v92_v51 = vrot.slane %v76_v40, 6  ;;  %v150_v56 = vld [vmem:[%s1095_s1 + $0x3] sm:$0x1] }
   0xd   :  { %v135_v52 = vsel %vm54_vm3, %v134_v32, %v133_v47  ;;  %v94_v53 = vrot.slane %v77_v43, 5  ;;  %v96_v54 = vrot.slane %v78_v44, 4  ;;  %v98_v55 = vrot.slane %v79_v45, 3  ;;  %v151_v61 = vld [vmem:[%s1095_s1 + $0xb] sm:$0x1] }
   0xe   :  { %v68_v57 = vsel %vm67_vm7, %v66_v46, 0.0  ;;  %v137_v58 = vsel %vm57_vm4, %v136_v33, %v135_v52  ;;  %v91_v59 = vsel %vm45_vm0, %v90_v50, %v74_v34  ;;  %v100_v60 = vrot.slane %v80_v48, 2  ;;  %v152_v62 = vld [vmem:[%s1095_s1 + $0x13] sm:$0x1]  ;;  %v153_v2 = vld [vmem:[%s1095_s1 + $0x1b] sm:$0x1] }
   0xf   :  { %69 = vadd.xlane.f32.xlu0 %v68_v57  ;;  %v139_v63 = vsel %vm60_vm5, %v138_v37, %v137_v58  ;;  %v93_v0 = vsel %vm48_vm1, %v92_v51, %v91_v59  ;;  %v102_v1 = vrot.slane %v81_v49, 1  ;;  %v154_v3 = vld [vmem:[%s1095_s1 + $0x23] sm:$0x1]  ;;  %v166_v4 = vrot.slane %v151_v61, 7  ;;  %v155_v7 = vld [vmem:[%s1095_s1 + $0x2b] sm:$0x1] }
  0x10   :  { %v843_v5 = vsel %vm63_vm6, %v140_v38, %v139_v63  ;;  %v95_v6 = vsel %vm51_vm2, %v94_v53, %v93_v0  ;;  %v156_v8 = vld [vmem:[%s1095_s1 + $0x33] sm:$0x1]  ;;  %v157_v9 = vld [vmem:[%s1095_s1 + $0x3b] sm:$0x1]  ;;  %v168_v13 = vrot.slane %v152_v62, 6  ;;  %v170_v17 = vrot.slane %v153_v2, 5 }
  0x11   :  { %v143_v10 = vmul.f32 %v843_v5, %v785_v30  ;;  %v97_v11 = vsel %vm54_vm3, %v96_v54, %v95_v6  ;;  %v167_v12 = vsel %vm45_vm0, %v166_v4, %v150_v56  ;;  %v188_v14 = vld [vmem:[%s1095_s1 + $0x4] sm:$0x1]  ;;  %v189_v15 = vld [vmem:[%s1095_s1 + $0xc] sm:$0x1]  ;;  %v172_v18 = vrot.slane %v154_v3, 4 }
  0x12   :  { %v99_v16 = vsel %vm57_vm4, %v98_v55, %v97_v11  ;;  %v174_v19 = vrot.slane %v155_v7, 3  ;;  %v190_v20 = vld [vmem:[%s1095_s1 + $0x14] sm:$0x1]  ;;  %v169_v23 = vsel %vm48_vm1, %v168_v13, %v167_v12  ;;  %v176_v24 = vrot.slane %v156_v8, 2  ;;  %v191_v25 = vld [vmem:[%s1095_s1 + $0x1c] sm:$0x1] }
  0x13   :  { %v144_v21 = vsel %vm67_vm7, %v143_v10, 0.0  ;;  %v101_v22 = vsel %vm60_vm5, %v100_v60, %v99_v16  ;;  %v192_v26 = vld [vmem:[%s1095_s1 + $0x24] sm:$0x1]  ;;  %v171_v28 = vsel %vm51_vm2, %v170_v17, %v169_v23  ;;  %v178_v29 = vrot.slane %v157_v9, 1  ;;  %v193_v31 = vld [vmem:[%s1095_s1 + $0x2c] sm:$0x1] }
  0x14   :  { %145 = vadd.xlane.f32.xlu1 %v144_v21  ;;  %v879_v27 = vsel %vm63_vm6, %v102_v1, %v101_v22  ;;  %v194_v32 = vld [vmem:[%s1095_s1 + $0x34] sm:$0x1]  ;;  %v204_v33 = vrot.slane %v189_v15, 7  ;;  %v173_v35 = vsel %vm54_vm3, %v172_v18, %v171_v28  ;;  %v195_v36 = vld [vmem:[%s1095_s1 + $0x3c] sm:$0x1]  ;;  %v206_v37 = vrot.slane %v190_v20, 6 }
  0x15   :  { %v105_v34 = vmul.f32 %v879_v27, %v785_v30  ;;  %v208_v38 = vrot.slane %v191_v25, 5  ;;  %v226_v39 = vld [vmem:[%s1095_s1 + $0x5] sm:$0x1]  ;;  %v175_v40 = vsel %vm57_vm4, %v174_v19, %v173_v35  ;;  %v210_v43 = vrot.slane %v192_v26, 4  ;;  %v227_v45 = vld [vmem:[%s1095_s1 + $0xd] sm:$0x1] }
  0x16   :  { %v205_v42 = vsel %vm45_vm0, %v204_v33, %v188_v14  ;;  %v212_v44 = vrot.slane %v193_v31, 3  ;;  %v228_v46 = vld [vmem:[%s1095_s1 + $0x15] sm:$0x1]  ;;  %v177_v48 = vsel %vm60_vm5, %v176_v24, %v175_v40  ;;  %v214_v50 = vrot.slane %v194_v32, 2  ;;  %v229_v51 = vld [vmem:[%s1095_s1 + $0x1d] sm:$0x1] }
  0x17   :  { %v106_v47 = vsel %vm67_vm7, %v105_v34, 0.0  ;;  %v207_v49 = vsel %vm48_vm1, %v206_v37, %v205_v42  ;;  %v230_v52 = vld [vmem:[%s1095_s1 + $0x25] sm:$0x1]  ;;  %v915_v53 = vsel %vm63_vm6, %v178_v29, %v177_v48  ;;  %v216_v55 = vrot.slane %v195_v36, 1  ;;  %v231_v56 = vld [vmem:[%s1095_s1 + $0x2d] sm:$0x1] }
  0x18   :  { %107 = vadd.xlane.f32.xlu0 %v106_v47  ;;  %v209_v54 = vsel %vm51_vm2, %v208_v38, %v207_v49  ;;  %v232_v57 = vld [vmem:[%s1095_s1 + $0x35] sm:$0x1]  ;;  %v242_v58 = vrot.slane %v227_v45, 7  ;;  %v181_v59 = vmul.f32 %v915_v53, %v785_v30  ;;  %v233_v61 = vld [vmem:[%s1095_s1 + $0x3d] sm:$0x1]  ;;  %v244_v62 = vrot.slane %v228_v46, 6 }
  0x19   :  { %v211_v60 = vsel %vm54_vm3, %v210_v43, %v209_v54  ;;  %v246_v63 = vrot.slane %v229_v51, 5  ;;  %v264_v0 = vld [vmem:[%s1095_s1 + $0x6] sm:$0x1]  ;;  %v248_v3 = vrot.slane %v230_v52, 4  ;;  %v250_v4 = vrot.slane %v231_v56, 3 }
  0x1a   :  { %v213_v1 = vsel %vm57_vm4, %v212_v44, %v211_v60  ;;  %v243_v2 = vsel %vm45_vm0, %v242_v58, %v226_v39  ;;  %v265_v6 = vld [vmem:[%s1095_s1 + $0xe] sm:$0x1]  ;;  %v266_v7 = vld [vmem:[%s1095_s1 + $0x16] sm:$0x1]  ;;  %v182_v8 = vsel %vm67_vm7, %v181_v59, 0.0  ;;  %v252_v11 = vrot.slane %v232_v57, 2 }
  0x1b   :  { %v215_v9 = vsel %vm60_vm5, %v214_v50, %v213_v1  ;;  %v245_v10 = vsel %vm48_vm1, %v244_v62, %v243_v2  ;;  %v267_v12 = vld [vmem:[%s1095_s1 + $0x1e] sm:$0x1]  ;;  %v268_v13 = vld [vmem:[%s1095_s1 + $0x26] sm:$0x1]  ;;  %183 = vadd.xlane.f32.xlu1 %v182_v8  ;;  %v254_v16 = vrot.slane %v233_v61, 1  ;;  %v280_v19 = vrot.slane %v265_v6, 7 }
  0x1c   :  { %v951_v14 = vsel %vm63_vm6, %v216_v55, %v215_v9  ;;  %v247_v15 = vsel %vm51_vm2, %v246_v63, %v245_v10  ;;  %v269_v17 = vld [vmem:[%s1095_s1 + $0x2e] sm:$0x1]  ;;  %v270_v18 = vld [vmem:[%s1095_s1 + $0x36] sm:$0x1]  ;;  %v271_v22 = vld [vmem:[%s1095_s1 + $0x3e] sm:$0x1] }
  0x1d   :  { %v219_v20 = vmul.f32 %v951_v14, %v785_v30  ;;  %v249_v21 = vsel %vm54_vm3, %v248_v3, %v247_v15  ;;  %v282_v23 = vrot.slane %v266_v7, 6  ;;  %v284_v24 = vrot.slane %v267_v12, 5  ;;  %v302_v25 = vld [vmem:[%s1095_s1 + $0x7] sm:$0x1]  ;;  %v303_v32 = vld [vmem:[%s1095_s1 + $0xf] sm:$0x1] }
  0x1e   :  { %v251_v26 = vsel %vm57_vm4, %v250_v4, %v249_v21  ;;  %v281_v28 = vsel %vm45_vm0, %v280_v19, %v264_v0  ;;  %v286_v29 = vrot.slane %v268_v13, 4  ;;  %v288_v31 = vrot.slane %v269_v17, 3  ;;  %v304_v33 = vld [vmem:[%s1095_s1 + $0x17] sm:$0x1]  ;;  %v305_v38 = vld [vmem:[%s1095_s1 + $0x1f] sm:$0x1] }
  0x1f   :  { %v220_v34 = vsel %vm67_vm7, %v219_v20, 0.0  ;;  %v253_v35 = vsel %vm60_vm5, %v252_v11, %v251_v26  ;;  %v283_v36 = vsel %vm48_vm1, %v282_v23, %v281_v28  ;;  %v290_v37 = vrot.slane %v270_v18, 2  ;;  %v306_v39 = vld [vmem:[%s1095_s1 + $0x27] sm:$0x1]  ;;  %v307_v44 = vld [vmem:[%s1095_s1 + $0x2f] sm:$0x1] }
  0x20   :  { %221 = vadd.xlane.f32.xlu0 %v220_v34  ;;  %v987_v40 = vsel %vm63_vm6, %v254_v16, %v253_v35  ;;  %v285_v42 = vsel %vm51_vm2, %v284_v24, %v283_v36  ;;  %v292_v43 = vrot.slane %v271_v22, 1  ;;  %v308_v45 = vld [vmem:[%s1095_s1 + $0x37] sm:$0x1]  ;;  %v318_v46 = vrot.slane %v303_v32, 7  ;;  %v309_v49 = vld [vmem:[%s1095_s1 + $0x3f] sm:$0x1] }
  0x21   :  { %v257_v47 = vmul.f32 %v987_v40, %v785_v30  ;;  %v287_v48 = vsel %vm54_vm3, %v286_v29, %v285_v42  ;;  %v320_v50 = vrot.slane %v304_v33, 6  ;;  %v322_v51 = vrot.slane %v305_v38, 5 }
  0x22   :  { %14 = vsyncpa [#allocation5], 0  ;;  %v289_v52 = vsel %vm57_vm4, %v288_v31, %v287_v48  ;;  %v319_v54 = vsel %vm45_vm0, %v318_v46, %v302_v25  ;;  %v324_v55 = vrot.slane %v306_v39, 4  ;;  %v326_v56 = vrot.slane %v307_v44, 3  ;;  %v356_v9 = vld [vmem:[%s1096_s2] sm:$0xff]  ;;  %v357_v10 = vld [vmem:[%s1096_s2 + $0x8] sm:$0xff] }
  0x23   :  { %v258_v57 = vsel %vm67_vm7, %v257_v47, 0.0  ;;  %v291_v58 = vsel %vm60_vm5, %v290_v37, %v289_v52  ;;  %v321_v59 = vsel %vm48_vm1, %v320_v50, %v319_v54  ;;  %v328_v60 = vrot.slane %v308_v45, 2  ;;  %v360_v12 = vld [vmem:[%s1096_s2 + $0x20] sm:$0xff]  ;;  %v361_v13 = vld [vmem:[%s1096_s2 + $0x28] sm:$0xff]  ;;  %v358_v17 = vld [vmem:[%s1096_s2 + $0x10] sm:$0xff]  ;;  %s688_s27 = smov [#allocation2]  }
  0x24   :  { %259 = vadd.xlane.f32.xlu1 %v258_v57  ;;  %v1008_v61 = vsel %vm63_vm6, %v292_v43, %v291_v58  ;;  %v323_v62 = vsel %vm51_vm2, %v322_v51, %v321_v59  ;;  %v330_v63 = vrot.slane %v309_v49, 1  ;;  %v625_v11 = vpack.c.bf16 %v357_v10, %v356_v9  ;;  %v359_v18 = vld [vmem:[%s1096_s2 + $0x18] sm:$0xff]  ;;  %v362_v20 = vld [vmem:[%s1096_s2 + $0x30] sm:$0xff]  ;;  %s559_s28 = sshll.u32 %s688_s27, 4  ;;  %s560_s28 = int_to_ptr.vmem [resolvable:$true] %s559_s28 }
  0x25   :  { %v295_v0 = vmul.f32 %v1008_v61, %v785_v30  ;;  %v325_v1 = vsel %vm54_vm3, %v324_v55, %v323_v62  ;;  %v685_v15 = vmov 0.0|0.0   ;;  %v619_v16 = vpack.c.bf16 %v361_v13, %v360_v12  ;;  %v363_v21 = vld [vmem:[%s1096_s2 + $0x38] sm:$0xff]  ;;  %p642_p1 = scmp.lt.s32.totalorder %s560_s28, %s560_s28 }
  0x26   :  { %v327_v2 = vsel %vm57_vm4, %v326_v56, %v325_v1  ;;  %624 = vmatprep.subr.bf16.mxu1 %v685_v15  ;;  %618 = vmatprep.subr.bf16.mxu0 %v685_v15  ;;  %v628_v19 = vpack.c.bf16 %v359_v18, %v358_v17  ;;  %v622_v22 = vpack.c.bf16 %v363_v21, %v362_v20  ;;  %vm686_vm8 = vmmov 0  }
  0x27   :  { %v296_v3 = vsel %vm67_vm7, %v295_v0, 0.0  ;;  %v329_v4 = vsel %vm60_vm5, %v328_v60, %v327_v2  ;;  %626 = vmatpush3.bf16.msra.mxu1 %v625_v11  ;;  %620 = vmatpush3.bf16.msra.mxu0 %v619_v16  ;;  %v687_v23 = vmov 0.0   ;;  %vm340_vm9 = vcmask 7168  }
  0x28   :  { %297 = vadd.xlane.f32.xlu0 %v296_v3  ;;  %v1018_v6 = vsel %vm63_vm6, %v330_v63, %v329_v4  ;;  %627 = vmatprep.subr.bf16.mxu1 %v685_v15  ;;  %vm342_vm10 = vcmask 15360   ;;  %vm344_vm11 = vcmask 23552   ;;  %vm346_vm12 = vcmask 31744  }
  0x29   :  { %v333_v7 = vmul.f32 %v1018_v6, %v785_v30  ;;  %621 = vmatprep.subr.bf16.mxu0 %v685_v15  ;;  %615 = vmatprep.mubr.msk.f32.mxu1 %vm686_vm8, %v687_v23  ;;  %vm348_vm13 = vcmask 39936   ;;  %vm350_vm14 = vcmask 48128   ;;  %vm352_vm15 = vcmask 56320  }
  0x2a   :  { %604 = vmatprep.mubr.msk.f32.mxu0 %vm686_vm8, %v687_v23  ;;  %vm354_vm0 = vcmask 64512   ;;  %vm521_vm2 = vcmask 130048  }
  0x2b   :  { %v334_v8 = vsel %vm67_vm7, %v333_v7, 0.0  ;;  %629 = vmatpush3.bf16.msra.mxu1 %v628_v19  ;;  %623 = vmatpush3.bf16.msra.mxu0 %v622_v22 }
  0x2c   :  { %335 = vadd.xlane.f32.xlu1 %v334_v8 }
  0x2e   :  { %616 = vmatmul.mubr.msk.f32.vlgmr.msra.gmra.mrb[0].mxu1 %vm67_vm7, %v785_v30 }
  0x9c   :  { %v70_v24 = vpop.xlane.xlu0 %69 }
  0x9d   :  { %v71_v26 = vmul.f32 0.17677669, %v70_v24 }
  0x9f   :  { %v72_v32 = vmul.f32 %v71_v26, %v800_v41 }
  0xa1   :  { %v146_v25 = vpop.xlane.xlu1 %145 }
  0xa2   :  { %v147_v29 = vmul.f32 0.17677669, %v146_v25 }
  0xa4   :  { %v148_v35 = vmul.f32 %v147_v29, %v843_v5 }
  0xa5   :  { %v108_v28 = vpop.xlane.xlu0 %107 }
  0xa6   :  { %v109_v31 = vmul.f32 0.17677669, %v108_v28 }
  0xa8   :  { %v110_v33 = vmul.f32 %v109_v31, %v879_v27  ;;  %v184_v34 = vpop.xlane.xlu1 %183  ;;  %v341_v38 = vsel %vm340_vm9, %v71_v26, %v109_v31 }
  0xa9   :  { %v185_v37 = vmul.f32 0.17677669, %v184_v34  ;;  %v343_v45 = vsel %vm342_vm10, %v341_v38, %v147_v29 }
  0xaa   :  { %v111_v36 = vadd.f32 %v110_v33, %v72_v32 }
  0xab   :  { %v186_v30 = vmul.f32 %v185_v37, %v915_v53  ;;  %v345_v27 = vsel %vm344_vm11, %v343_v45, %v185_v37 }
  0xac   :  { %v149_v39 = vadd.f32 %v148_v35, %v111_v36 }
  0xad   :  { %v222_v42 = vpop.xlane.xlu0 %221 }
  0xae   :  { %v187_v43 = vadd.f32 %v186_v30, %v149_v39  ;;  %v223_v44 = vmul.f32 0.17677669, %v222_v42 }
  0xb0   :  { %v224_v41 = vmul.f32 %v223_v44, %v951_v14  ;;  %v347_v49 = vsel %vm346_vm12, %v345_v27, %v223_v44 }
  0xb1   :  { %v260_v46 = vpop.xlane.xlu1 %259 }
  0xb2   :  { %v225_v47 = vadd.f32 %v224_v41, %v187_v43  ;;  %v261_v48 = vmul.f32 0.17677669, %v260_v46 }
  0xb4   :  { %v262_v5 = vmul.f32 %v261_v48, %v987_v40  ;;  %v349_v53 = vsel %vm348_vm13, %v347_v49, %v261_v48 }
  0xb5   :  { %v298_v50 = vpop.xlane.xlu0 %297 }
  0xb6   :  { %v263_v51 = vadd.f32 %v262_v5, %v225_v47  ;;  %v299_v52 = vmul.f32 0.17677669, %v298_v50 }
  0xb8   :  { %v300_v54 = vmul.f32 %v299_v52, %v1008_v61  ;;  %v351_v56 = vsel %vm350_vm14, %v349_v53, %v299_v52  ;;  %v583_v61 = vld [vmem:[%s1097_s3] ss:$0 sm:$0xff]  ;;  %s637_s3 = scalar_lea.vmem %s560_s28, 128 }
  0xb9   :  { %v336_v55 = vpop.xlane.xlu1 %335  ;;  %p638_p0 = scmp.ne.s32.totalorder %s560_s28, %s637_s3  ;;  %p643_p2 = scmp.lt.s32.totalorder %s637_s3, %s637_s3 }
  0xba   :  { %v301_v14 = vadd.f32 %v300_v54, %v263_v51  ;;  %v337_v57 = vmul.f32 0.17677669, %v336_v55 }
  0xbb   :  { %p644_p3 = por %p643_p2, %p642_p1 }
  0xbc   :  { %v338_v58 = vmul.f32 %v337_v57, %v1018_v6  ;;  %v353_v59 = vsel %vm352_vm15, %v351_v56, %v337_v57 }
  0xbd   :  { %355 = vst.msk [vmem:[#allocation2] sm:$0xff] %vm354_vm0, %v353_v59  ;;  %p645_p4 = pnand %p644_p3, %p638_p0 }
  0xbe   :  { %v339_v40 = vadd.f32 %v338_v58, %v301_v14 }
  0xc0   :  { %605 = vmatmul.mubr.msk.f32.vlgmr.msra.gmra.mrb[0].mxu0 %vm67_vm7, %v339_v40 }
 0x101   :  { %v506_v60 = vpop.f32.mrb[0].mxu1 }
 0x102   :  { %v617_v62 = vpop.f32.mrb[1].mxu1 }
 0x193   :  { %v433_v63 = vpop.f32.mrb[0].mxu0 }
 0x194   :  { %v507_v0 = vadd.f32 %v506_v60, %v433_v63  ;;  %v606_v1 = vpop.f32.mrb[1].mxu0 }
 0x196   :  { %v517_v2 = vadd.f32 %v583_v61, %v507_v0 }
 0x198   :  { %vm518_vm1 = vcmp.gt.f32.partialorder %v517_v2, 0.0  ;;  %v519_v3 = vmul.f32 0.01, %v517_v2 }
 0x19a   :  { %v520_v4 = vsel %vm518_vm1, %v517_v2, %v519_v3 }
 0x19b   :  { %v522_v6 = vsel %vm521_vm2, %v520_v4, 0.0 }
 0x19c   :  { %523 = vadd.xlane.f32.xlu0 %v522_v6 }
 0x229   :  { %v524_v7 = vpop.xlane.xlu0 %523 }
 0x22a   :  { %v526_v8 = vmul.f32 0.0625, %v524_v7 }
 0x22c   :  { %v527_v9 = vsub.f32 %v520_v4, %v526_v8 }
 0x22e   :  { %v528_v10 = vmul.f32 %v527_v9, %v527_v9 }
 0x230   :  { %v529_v11 = vsel %vm521_vm2, %v528_v10, 0.0 }
 0x231   :  { %530 = vadd.xlane.f32.xlu1 %v529_v11 }
 0x232   :  { %648 = shalt.err (!%p645_p4)
}
 0x233   :  { %s649_s8 = scalar_lea.hbm %s1100_s6, 128 }
 0x234   :  { %p650_p5 = scmp.ne.s32.totalorder %s1100_s6, %s649_s8  ;;  %p653_p6 = scmp.lt.u32.totalorder %s649_s8, %s1100_s6 }
 0x236   :  { %p655_p7 = pnand %p653_p6, %p650_p5 }
 0x238   :  { %658 = shalt.err (!%p655_p7)
}
 0x239   :  { %562 = dma.vmem_to_hbm [thread:$0]  %s560_s28, 128, %s1100_s6, [#allocation3]   ;;  %v584_v17 = vld [vmem:[%s1098_s4] ss:$0 sm:$0xff] }
 0x23a   :  { %v585_v19 = vld [vmem:[%s1099_s5] ss:$0 sm:$0xff]  ;;  %s689_s17 = smov [#allocation4]  }
 0x23b   :  { %s569_s18 = sshll.u32 %s689_s17, 4  ;;  %s570_s18 = int_to_ptr.vmem [resolvable:$true] %s569_s18 }
 0x23c   :  { %s659_s6 = scalar_lea.vmem %s570_s18, 128  ;;  %p664_p9 = scmp.lt.s32.totalorder %s570_s18, %s570_s18 }
 0x23d   :  { %p660_p8 = scmp.ne.s32.totalorder %s570_s18, %s659_s6  ;;  %p665_p10 = scmp.lt.s32.totalorder %s659_s6, %s659_s6 }
 0x23f   :  { %p666_p11 = por %p665_p10, %p664_p9 }
 0x241   :  { %p667_p12 = pnand %p666_p11, %p660_p8 }
 0x2be   :  { %v531_v12 = vpop.xlane.xlu1 %530 }
 0x2bf   :  { %v532_v13 = vmul.f32 0.0625, %v531_v12 }
 0x2c1   :  { %v533_v15 = vadd.f32 1e-05, %v532_v13 }
 0x2c3   :  { %635 = vrsqrt.f32 %v533_v15 }
 0x2cd   :  { %v636_v16 = vpop.eup %635 }
 0x2ce   :  { %v535_v18 = vmul.f32 %v636_v16, %v527_v9 }
 0x2d0   :  { %v543_v20 = vmul.f32 %v584_v17, %v535_v18 }
 0x2d2   :  { %v551_v21 = vadd.f32 %v585_v19, %v543_v20 }
 0x2d4   :  { %552 = vst.msk [vmem:[#allocation4] sm:$0xff] %vm521_vm2, %v551_v21 }
 0x2d5   :  { %670 = shalt.err (!%p667_p12)
}
 0x2d6   :  { %s671_s20 = scalar_lea.hbm %s1101_s7, 128 }
 0x2d7   :  { %p672_p13 = scmp.ne.s32.totalorder %s1101_s7, %s671_s20  ;;  %p675_p0 = scmp.lt.u32.totalorder %s671_s20, %s1101_s7 }
 0x2d9   :  { %p677_p1 = pnand %p675_p0, %p672_p13 }
 0x2db   :  { %680 = shalt.err (!%p677_p1)
}
 0x2dc   :  { %572 = dma.vmem_to_hbm [thread:$0]  %s570_s18, 128, %s1101_s7, [#allocation5]  }
 0x2dd   :  { %681 = dma.done.wait [#allocation3], 128  }
 0x2de   :  { %682 = vsyncadd [#allocation3], 4294967168 }
 0x2df   :  { %683 = dma.done.wait [#allocation5], 128  }
 0x2e0   :  { %684 = vsyncadd [#allocation5], 4294967168 }
 0x2e1   :  { %579 = vsyncpa [#allocation3], 1 }
 0x2e2   :  { %580 = vsyncpa [#allocation5], 1 }

</bundles_post_ra>
